<compile_context>
chip_gen: v7x
topology: tpu7x:2x2x1
jax: 0.10.0
libtpu: 0.0.40
codegen_flags: <defaults>
</compile_context>

<pallas_src>
import functools

import jax
import jax.numpy as jnp
from jax import lax
from jax.experimental import pallas as pl
from jax.experimental.pallas import tpu as pltpu


def _pick_block(dim, target, align):
    """Largest block <= target that divides `dim` and is a multiple of `align`;
    falls back to the full dimension (full-extent blocks are always legal)."""
    if dim <= target:
        return dim
    b = (target // align) * align
    while b >= align:
        if dim % b == 0:
            return b
        b -= align
    return dim


# ---------------------------------------------------------------------------
# Kernel 1: Conv1D == x @ W + b  (weights stored as (nx, nf), like GPT-2)
# Tiled over (M, nf, nx) with an f32 VMEM accumulator; bias fused in epilogue.
# ---------------------------------------------------------------------------
def _conv1d_kernel(x_ref, w_ref, b_ref, o_ref, acc_ref, *, compute_dtype):
    k = pl.program_id(2)

    @pl.when(k == 0)
    def _init():
        acc_ref[...] = jnp.zeros_like(acc_ref)

    acc_ref[...] += jnp.dot(
        x_ref[...].astype(compute_dtype),
        w_ref[...].astype(compute_dtype),
        preferred_element_type=jnp.float32,
    )

    @pl.when(k == pl.num_programs(2) - 1)
    def _fin():
        o_ref[...] = (acc_ref[...] + b_ref[...].astype(jnp.float32)).astype(o_ref.dtype)


def conv1d(x2d, w, b, *, compute_dtype=jnp.float32, tm=256, tn=256, tk=512):
    """x2d: (M, nx); w: (nx, nf); b: (nf,) -> (M, nf)."""
    M, nx = x2d.shape
    nf = w.shape[1]
    bm = _pick_block(M, tm, 8)     # sublane dim of x/out blocks
    bn = _pick_block(nf, tn, 128)  # lane dim of w/out blocks
    bk = _pick_block(nx, tk, 128)  # lane dim of x block / sublane dim of w block
    grid = (M // bm, nf // bn, nx // bk)
    b2d = b.reshape(1, nf)
    kernel = functools.partial(_conv1d_kernel, compute_dtype=compute_dtype)
    return pl.pallas_call(
        kernel,
        out_shape=jax.ShapeDtypeStruct((M, nf), x2d.dtype),
        grid=grid,
        in_specs=[
            pl.BlockSpec((bm, bk), lambda i, j, k: (i, k)),
            pl.BlockSpec((bk, bn), lambda i, j, k: (k, j)),
            pl.BlockSpec((1, bn), lambda i, j, k: (0, j)),
        ],
        out_specs=pl.BlockSpec((bm, bn), lambda i, j, k: (i, j)),
        scratch_shapes=[pltpu.VMEM((bm, bn), jnp.float32)],
        compiler_params=pltpu.CompilerParams(
            dimension_semantics=("parallel", "parallel", "arbitrary")),
    )(x2d, w, b2d)


# ---------------------------------------------------------------------------
# Kernel 2: flash-attention style causal multi-head attention core.
#   grid = (B*H, num_q_blocks, num_kv_blocks), KV axis last ("arbitrary").
#   Online softmax: m/l/acc VMEM scratch carried across KV blocks.
#   KV blocks strictly above the diagonal are skipped (exp(-10000-m) underflows
#   to exactly 0 in f32, so this matches the -10000 masking of the reference).
# ---------------------------------------------------------------------------
def _flash_attn_kernel(q_ref, k_ref, v_ref, o_ref, m_ref, l_ref, acc_ref, *,
                       compute_dtype):
    qi = pl.program_id(1)
    ki = pl.program_id(2)
    block_q = q_ref.shape[1]
    block_kv = k_ref.shape[1]

    @pl.when(ki == 0)
    def _init():
        m_ref[...] = jnp.full_like(m_ref, -jnp.inf)
        l_ref[...] = jnp.zeros_like(l_ref)
        acc_ref[...] = jnp.zeros_like(acc_ref)

    def _scores():
        q = q_ref[0].astype(compute_dtype)
        k = k_ref[0].astype(compute_dtype)
        # q @ k^T without an explicit transpose (contract last dims on the MXU).
        return lax.dot_general(q, k, (((1,), (1,)), ((), ())),
                               preferred_element_type=jnp.float32)  # (tq, tkv) f32

    def _online_update(s):
        v = v_ref[0].astype(compute_dtype)
        m_prev = m_ref[...]                                          # (tq, 1)
        m_new = jnp.maximum(m_prev, jnp.max(s, axis=-1, keepdims=True))
        alpha = jnp.exp(m_prev - m_new)
        p = jnp.exp(s - m_new)                                       # (tq, tkv) f32
        l_ref[...] = alpha * l_ref[...] + jnp.sum(p, axis=-1, keepdims=True)
        acc_ref[...] = alpha * acc_ref[...] + jnp.dot(
            p.astype(compute_dtype), v, preferred_element_type=jnp.float32)
        m_ref[...] = m_new

    # Blocks strictly below the diagonal: no mask needed.
    @pl.when(ki < qi)
    def _off_diag():
        _online_update(_scores())

    # Diagonal block: apply the causal mask with -10000 (matches torch module).
    @pl.when(ki == qi)
    def _diag():
        s = _scores()
        row = lax.broadcasted_iota(jnp.int32, (block_q, block_kv), 0)
        col = lax.broadcasted_iota(jnp.int32, (block_q, block_kv), 1)
        s = jnp.where(col <= row, s, jnp.float32(-10000.0))
        _online_update(s)

    # Blocks with ki > qi are fully masked -> skipped (no compute).

    @pl.when(ki == pl.num_programs(2) - 1)
    def _fin():
        inv_l = pl.reciprocal(l_ref[...], approx=True)
        o_ref[0] = (acc_ref[...] * inv_l).astype(o_ref.dtype)


def attn_core(q, k, v, *, compute_dtype=jnp.float32, block=256):
    """q, k, v: (B*H, T, D) -> (B*H, T, D) causal attention (scale=False)."""
    BH, T, D = q.shape
    blk = _pick_block(T, block, 8)  # same block for Q and KV (diag-block masking)
    grid = (BH, T // blk, T // blk)
    q_spec = pl.BlockSpec((1, blk, D), lambda b, qi, ki: (b, qi, 0))
    kv_spec = pl.BlockSpec((1, blk, D), lambda b, qi, ki: (b, ki, 0))
    kernel = functools.partial(_flash_attn_kernel, compute_dtype=compute_dtype)
    # TODO(synk): for D < 128, pack multiple heads per grid step for lane-dense
    # output stores (avoids masked vst.msk); omitted for clarity here.
    return pl.pallas_call(
        kernel,
        out_shape=jax.ShapeDtypeStruct((BH, T, D), q.dtype),
        grid=grid,
        in_specs=[q_spec, kv_spec, kv_spec],
        out_specs=pl.BlockSpec((1, blk, D), lambda b, qi, ki: (b, qi, 0)),
        scratch_shapes=[
            pltpu.VMEM((blk, 1), jnp.float32),   # running max m
            pltpu.VMEM((blk, 1), jnp.float32),   # running sum l
            pltpu.VMEM((blk, D), jnp.float32),   # output accumulator
        ],
        compiler_params=pltpu.CompilerParams(
            dimension_semantics=("parallel", "parallel", "arbitrary")),
    )(q, k, v)


# ---------------------------------------------------------------------------
# Full Attention module forward (glue in plain JAX, hot paths in Pallas)
# ---------------------------------------------------------------------------
def attention_forward(params, x, n_head, compute_dtype=jnp.float32):
    """x: (B, T, nx) -> (B, T, nx). Equivalent to Attention.forward(...)[0]."""
    B, T, nx = x.shape
    assert nx % n_head == 0
    D = nx // n_head

    # c_attn: (B*T, nx) @ (nx, 3nx) + b
    x2d = x.reshape(B * T, nx)
    qkv = conv1d(x2d, params["w_attn"], params["b_attn"],
                 compute_dtype=compute_dtype)                  # (B*T, 3nx)
    qkv = qkv.reshape(B, T, 3 * nx)
    query, key, value = jnp.split(qkv, 3, axis=2)              # each (B, T, nx)

    # TODO(synk): head split/merge still materializes (B,H,T,D) copies in HBM;
    # could be folded into the attention BlockSpec index_maps for real model dims.
    def split_heads(t):
        return t.reshape(B, T, n_head, D).transpose(0, 2, 1, 3).reshape(B * n_head, T, D)

    q = split_heads(query)
    k = split_heads(key)   # kernel contracts last dims (== q @ k^T), matching split_heads(k, k=True)
    v = split_heads(value)

    a = attn_core(q, k, v, compute_dtype=compute_dtype)        # (B*H, T, D)

    # merge heads: (B*H, T, D) -> (B, T, nx)
    a = a.reshape(B, n_head, T, D).transpose(0, 2, 1, 3).reshape(B, T, nx)

    # c_proj
    # TODO(synk): c_proj could be fused as an epilogue of the attention kernel to
    # save one (B,T,nx) HBM round-trip; kept as a separate tiled matmul here.
    out = conv1d(a.reshape(B * T, nx), params["w_proj"], params["b_proj"],
                 compute_dtype=compute_dtype)
    # TODO(synk): attn_dropout / resid_dropout omitted (identity in eval mode).
    return out.reshape(B, T, nx)


# ---------------------------------------------------------------------------
# Pure-JAX reference for verification
# ---------------------------------------------------------------------------
def attention_reference(params, x, n_head):
    B, T, nx = x.shape
    D = nx // n_head
    qkv = x.reshape(B * T, nx) @ params["w_attn"] + params["b_attn"]
    qkv = qkv.reshape(B, T, 3 * nx)
    query, key, value = jnp.split(qkv, 3, axis=2)

    def sh(t):
        return t.reshape(B, T, n_head, D).transpose(0, 2, 1, 3)  # (B, H, T, D)

    q, k, v = sh(query), sh(key), sh(value)
    w = jnp.einsum("bhqd,bhkd->bhqk", q, k)
    mask = jnp.tril(jnp.ones((T, T), dtype=bool))
    w = jnp.where(mask[None, None], w, jnp.float32(-10000.0))
    w = jax.nn.softmax(w, axis=-1)
    a = jnp.einsum("bhqk,bhkd->bhqd", w, v)
    a = a.transpose(0, 2, 1, 3).reshape(B, T, nx)
    out = a.reshape(B * T, nx) @ params["w_proj"] + params["b_proj"]
    return out.reshape(B, T, nx)


if __name__ == "__main__":
    # small shapes consistent with the module (n_ctx == T)
    B, T, nx, n_head = 2, 8, 32, 4

    key = jax.random.PRNGKey(0)
    k_x, k_wa, k_wp = jax.random.split(key, 3)

    x = jax.random.normal(k_x, (B, T, nx), dtype=jnp.float32)
    params = {
        "w_attn": 0.02 * jax.random.normal(k_wa, (nx, 3 * nx), dtype=jnp.float32),
        "b_attn": jnp.zeros((3 * nx,), dtype=jnp.float32),
        "w_proj": 0.02 * jax.random.normal(k_wp, (nx, nx), dtype=jnp.float32),
        "b_proj": jnp.zeros((nx,), dtype=jnp.float32),
    }

    ref = attention_reference(params, x, n_head)

    # f32 MXU operands (tight check)
    fwd_f32 = jax.jit(functools.partial(attention_forward, n_head=n_head,
                                        compute_dtype=jnp.float32))
    out_f32 = fwd_f32(params, x)
    jax.block_until_ready(out_f32)
    assert out_f32.shape == (B, T, nx)
    assert jnp.allclose(out_f32, ref, atol=1e-3, rtol=1e-3), "f32 mismatch vs reference"

    # bf16 MXU operands with f32 accumulation / f32 softmax stats (loose check)
    fwd_bf16 = jax.jit(functools.partial(attention_forward, n_head=n_head,
                                         compute_dtype=jnp.bfloat16))
    out_bf16 = fwd_bf16(params, x)
    jax.block_until_ready(out_bf16)
    assert out_bf16.shape == (B, T, nx)
    assert jnp.allclose(out_bf16, ref, atol=5e-2, rtol=5e-2), "bf16 mismatch vs reference"

    print("KERNEL_OK")
</pallas_src>

<mosaic_0001>
module attributes {stable_mosaic.version = 11 : i64} {
  func.func @_conv1d_kernel(%arg0: i32, %arg1: i32, %arg2: i32, %arg3: memref<16x32xf32, #tpu.memory_space<vmem>>, %arg4: memref<32x96xf32, #tpu.memory_space<vmem>>, %arg5: memref<1x96xf32, #tpu.memory_space<vmem>>, %arg6: memref<16x96xf32, #tpu.memory_space<vmem>>, %arg7: memref<16x96xf32, #tpu.memory_space<vmem>>) attributes {dimension_semantics = [#tpu.dimension_semantics<parallel>, #tpu.dimension_semantics<parallel>, #tpu.dimension_semantics<arbitrary>], iteration_bounds = array<i64: 1, 1, 1>, scalar_prefetch = 0 : i64, scratch_operands = 1 : i64, tpu.core_type = #tpu.core_type<tc>, window_params = [{transform_indices = @transform_0, window_bounds = array<i64: 16, 32>}, {transform_indices = @transform_1, window_bounds = array<i64: 32, 96>}, {transform_indices = @transform_2, window_bounds = array<i64: 1, 96>}, {transform_indices = @transform_3, window_bounds = array<i64: 16, 96>}]} {
    %c0_i32 = arith.constant 0 : i32
    %0 = arith.cmpi eq, %arg2, %c0_i32 : i32
    %1 = arith.extui %0 : i1 to i32
    %c0_i32_0 = arith.constant 0 : i32
    %2 = arith.cmpi ne, %1, %c0_i32_0 : i32
    scf.if %2 {
      %cst_10 = arith.constant 0.000000e+00 : f32
      %12 = vector.broadcast %cst_10 : f32 to vector<16x96xf32>
      %c0_11 = arith.constant 0 : index
      %c0_12 = arith.constant 0 : index
      %13 = vector.load %arg7[%c0_11, %c0_12] : memref<16x96xf32, #tpu.memory_space<vmem>>, vector<16x96xf32>
      tpu.vector_store %arg7[%c0_11, %c0_12], %12 {strides = array<i32>} : memref<16x96xf32, #tpu.memory_space<vmem>>, vector<16x96xf32>,
    } else {
    }
    %c0 = arith.constant 0 : index
    %c0_1 = arith.constant 0 : index
    %3 = vector.load %arg7[%c0, %c0_1] : memref<16x96xf32, #tpu.memory_space<vmem>>, vector<16x96xf32>
    %c0_2 = arith.constant 0 : index
    %c0_3 = arith.constant 0 : index
    %4 = vector.load %arg3[%c0_2, %c0_3] : memref<16x32xf32, #tpu.memory_space<vmem>>, vector<16x32xf32>
    %c0_4 = arith.constant 0 : index
    %c0_5 = arith.constant 0 : index
    %5 = vector.load %arg4[%c0_4, %c0_5] : memref<32x96xf32, #tpu.memory_space<vmem>>, vector<32x96xf32>
    %cst = arith.constant dense<0.000000e+00> : vector<16x96xf32>
    %6 = tpu.matmul %4, %5, %cst {dimension_numbers = #tpu.dot_dimension_numbers<[1], [0], [0], [1], [0, 0, 1, 1], [], []>} : vector<16x32xf32>, vector<32x96xf32>, vector<16x96xf32> -> vector<16x96xf32>
    %7 = arith.addf %3, %6 : vector<16x96xf32>
    %c0_6 = arith.constant 0 : index
    %c0_7 = arith.constant 0 : index
    %8 = vector.load %arg7[%c0_6, %c0_7] : memref<16x96xf32, #tpu.memory_space<vmem>>, vector<16x96xf32>
    tpu.vector_store %arg7[%c0_6, %c0_7], %7 {strides = array<i32>} : memref<16x96xf32, #tpu.memory_space<vmem>>, vector<16x96xf32>,
    %c0_i32_8 = arith.constant 0 : i32
    %9 = arith.cmpi eq, %arg2, %c0_i32_8 : i32
    %10 = arith.extui %9 : i1 to i32
    %c0_i32_9 = arith.constant 0 : i32
    %11 = arith.cmpi ne, %10, %c0_i32_9 : i32
    scf.if %11 {
      %c0_10 = arith.constant 0 : index
      %c0_11 = arith.constant 0 : index
      %12 = vector.load %arg7[%c0_10, %c0_11] : memref<16x96xf32, #tpu.memory_space<vmem>>, vector<16x96xf32>
      %c0_12 = arith.constant 0 : index
      %c0_13 = arith.constant 0 : index
      %13 = vector.load %arg5[%c0_12, %c0_13] : memref<1x96xf32, #tpu.memory_space<vmem>>, vector<1x96xf32>
      %14 = vector.broadcast %13 : vector<1x96xf32> to vector<16x96xf32>
      %15 = arith.addf %12, %14 : vector<16x96xf32>
      %c0_14 = arith.constant 0 : index
      %c0_15 = arith.constant 0 : index
      %16 = vector.load %arg6[%c0_14, %c0_15] : memref<16x96xf32, #tpu.memory_space<vmem>>, vector<16x96xf32>
      tpu.vector_store %arg6[%c0_14, %c0_15], %15 {strides = array<i32>} : memref<16x96xf32, #tpu.memory_space<vmem>>, vector<16x96xf32>,
    } else {
    }
    return
  }
  func.func @transform_0(%arg0: i32, %arg1: i32, %arg2: i32) -> (i32, i32) {
    %c0_i32 = arith.constant 0 : i32
    return %arg0, %arg2 : i32, i32
  }
  func.func @transform_1(%arg0: i32, %arg1: i32, %arg2: i32) -> (i32, i32) {
    %c0_i32 = arith.constant 0 : i32
    return %arg2, %arg1 : i32, i32
  }
  func.func @transform_2(%arg0: i32, %arg1: i32, %arg2: i32) -> (i32, i32) {
    %c0_i32 = arith.constant 0 : i32
    %c0_i32_0 = arith.constant 0 : i32
    return %c0_i32, %arg1 : i32, i32
  }
  func.func @transform_3(%arg0: i32, %arg1: i32, %arg2: i32) -> (i32, i32) {
    %c0_i32 = arith.constant 0 : i32
    return %arg0, %arg1 : i32, i32
  }
}

module attributes {stable_mosaic.version = 11 : i64} {
  func.func @_flash_attn_kernel(%arg0: i32, %arg1: i32, %arg2: i32, %arg3: memref<1x8x8xf32, #tpu.memory_space<vmem>>, %arg4: memref<1x8x8xf32, #tpu.memory_space<vmem>>, %arg5: memref<1x8x8xf32, #tpu.memory_space<vmem>>, %arg6: memref<1x8x8xf32, #tpu.memory_space<vmem>>, %arg7: memref<8x1xf32, #tpu.memory_space<vmem>>, %arg8: memref<8x1xf32, #tpu.memory_space<vmem>>, %arg9: memref<8x8xf32, #tpu.memory_space<vmem>>) attributes {dimension_semantics = [#tpu.dimension_semantics<parallel>, #tpu.dimension_semantics<parallel>, #tpu.dimension_semantics<arbitrary>], iteration_bounds = array<i64: 8, 1, 1>, scalar_prefetch = 0 : i64, scratch_operands = 3 : i64, tpu.core_type = #tpu.core_type<tc>, window_params = [{transform_indices = @transform_0, window_bounds = array<i64: 1, 8, 8>}, {transform_indices = @transform_1, window_bounds = array<i64: 1, 8, 8>}, {transform_indices = @transform_2, window_bounds = array<i64: 1, 8, 8>}, {transform_indices = @transform_3, window_bounds = array<i64: 1, 8, 8>}]} {
    %c0_i32 = arith.constant 0 : i32
    %0 = arith.cmpi eq, %arg2, %c0_i32 : i32
    %1 = arith.extui %0 : i1 to i32
    %c0_i32_0 = arith.constant 0 : i32
    %2 = arith.cmpi ne, %1, %c0_i32_0 : i32
    scf.if %2 {
      %cst = arith.constant 0xFF800000 : f32
      %12 = vector.broadcast %cst : f32 to vector<8x1xf32>
      %c0 = arith.constant 0 : index
      %c0_5 = arith.constant 0 : index
      %13 = vector.load %arg7[%c0, %c0_5] : memref<8x1xf32, #tpu.memory_space<vmem>>, vector<8x1xf32>
      tpu.vector_store %arg7[%c0, %c0_5], %12 {strides = array<i32>} : memref<8x1xf32, #tpu.memory_space<vmem>>, vector<8x1xf32>,
      %cst_6 = arith.constant 0.000000e+00 : f32
      %14 = vector.broadcast %cst_6 : f32 to vector<8x1xf32>
      %c0_7 = arith.constant 0 : index
      %c0_8 = arith.constant 0 : index
      %15 = vector.load %arg8[%c0_7, %c0_8] : memref<8x1xf32, #tpu.memory_space<vmem>>, vector<8x1xf32>
      tpu.vector_store %arg8[%c0_7, %c0_8], %14 {strides = array<i32>} : memref<8x1xf32, #tpu.memory_space<vmem>>, vector<8x1xf32>,
      %cst_9 = arith.constant 0.000000e+00 : f32
      %16 = vector.broadcast %cst_9 : f32 to vector<8x8xf32>
      %c0_10 = arith.constant 0 : index
      %c0_11 = arith.constant 0 : index
      %17 = vector.load %arg9[%c0_10, %c0_11] : memref<8x8xf32, #tpu.memory_space<vmem>>, vector<8x8xf32>
      tpu.vector_store %arg9[%c0_10, %c0_11], %16 {strides = array<i32>} : memref<8x8xf32, #tpu.memory_space<vmem>>, vector<8x8xf32>,
    } else {
    }
    %3 = arith.cmpi slt, %arg2, %arg1 : i32
    %4 = arith.extui %3 : i1 to i32
    %c0_i32_1 = arith.constant 0 : i32
    %5 = arith.cmpi ne, %4, %c0_i32_1 : i32
    scf.if %5 {
      %c0 = arith.constant 0 : index
      %c0_5 = arith.constant 0 : index
      %c0_6 = arith.constant 0 : index
      %12 = vector.load %arg3[%c0, %c0_5, %c0_6] : memref<1x8x8xf32, #tpu.memory_space<vmem>>, vector<1x8x8xf32>
      %13 = vector.shape_cast %12 : vector<1x8x8xf32> to vector<8x8xf32>
      %c0_7 = arith.constant 0 : index
      %c0_8 = arith.constant 0 : index
      %c0_9 = arith.constant 0 : index
      %14 = vector.load %arg4[%c0_7, %c0_8, %c0_9] : memref<1x8x8xf32, #tpu.memory_space<vmem>>, vector<1x8x8xf32>
      %15 = vector.shape_cast %14 : vector<1x8x8xf32> to vector<8x8xf32>
      %cst = arith.constant dense<0.000000e+00> : vector<8x8xf32>
      %16 = tpu.matmul %13, %15, %cst {dimension_numbers = #tpu.dot_dimension_numbers<[1], [1], [0], [0], [0, 0, 1, 0], [], []>} : vector<8x8xf32>, vector<8x8xf32>, vector<8x8xf32> -> vector<8x8xf32>
      %c0_10 = arith.constant 0 : index
      %c0_11 = arith.constant 0 : index
      %c0_12 = arith.constant 0 : index
      %17 = vector.load %arg5[%c0_10, %c0_11, %c0_12] : memref<1x8x8xf32, #tpu.memory_space<vmem>>, vector<1x8x8xf32>
      %18 = vector.shape_cast %17 : vector<1x8x8xf32> to vector<8x8xf32>
      %c0_13 = arith.constant 0 : index
      %c0_14 = arith.constant 0 : index
      %19 = vector.load %arg7[%c0_13, %c0_14] : memref<8x1xf32, #tpu.memory_space<vmem>>, vector<8x1xf32>
      %cst_15 = arith.constant dense<0xFF800000> : vector<8xf32>
      %20 = vector.multi_reduction <maximumf>, %16, %cst_15 [1] : vector<8x8xf32> to vector<8xf32>
      %21 = vector.shape_cast %20 : vector<8xf32> to vector<8x1xf32>
      %22 = arith.maximumf %19, %21 : vector<8x1xf32>
      %23 = arith.subf %19, %22 : vector<8x1xf32>
      %24 = math.exp %23 : vector<8x1xf32>
      %25 = vector.broadcast %22 : vector<8x1xf32> to vector<8x8xf32>
      %26 = arith.subf %16, %25 : vector<8x8xf32>
      %27 = math.exp %26 : vector<8x8xf32>
      %c0_16 = arith.constant 0 : index
      %c0_17 = arith.constant 0 : index
      %28 = vector.load %arg8[%c0_16, %c0_17] : memref<8x1xf32, #tpu.memory_space<vmem>>, vector<8x1xf32>
      %29 = arith.mulf %24, %28 : vector<8x1xf32>
      %cst_18 = arith.constant dense<0.000000e+00> : vector<8xf32>
      %30 = vector.multi_reduction <add>, %27, %cst_18 [1] : vector<8x8xf32> to vector<8xf32>
      %31 = vector.shape_cast %30 : vector<8xf32> to vector<8x1xf32>
      %32 = arith.addf %29, %31 : vector<8x1xf32>
      %c0_19 = arith.constant 0 : index
      %c0_20 = arith.constant 0 : index
      %33 = vector.load %arg8[%c0_19, %c0_20] : memref<8x1xf32, #tpu.memory_space<vmem>>, vector<8x1xf32>
      tpu.vector_store %arg8[%c0_19, %c0_20], %32 {strides = array<i32>} : memref<8x1xf32, #tpu.memory_space<vmem>>, vector<8x1xf32>,
      %c0_21 = arith.constant 0 : index
      %c0_22 = arith.constant 0 : index
      %34 = vector.load %arg9[%c0_21, %c0_22] : memref<8x8xf32, #tpu.memory_space<vmem>>, vector<8x8xf32>
      %35 = vector.broadcast %24 : vector<8x1xf32> to vector<8x8xf32>
      %36 = arith.mulf %35, %34 : vector<8x8xf32>
      %cst_23 = arith.constant dense<0.000000e+00> : vector<8x8xf32>
      %37 = tpu.matmul %27, %18, %cst_23 {dimension_numbers = #tpu.dot_dimension_numbers<[1], [0], [0], [1], [0, 0, 1, 1], [], []>} : vector<8x8xf32>, vector<8x8xf32>, vector<8x8xf32> -> vector<8x8xf32>
      %38 = arith.addf %36, %37 : vector<8x8xf32>
      %c0_24 = arith.constant 0 : index
      %c0_25 = arith.constant 0 : index
      %39 = vector.load %arg9[%c0_24, %c0_25] : memref<8x8xf32, #tpu.memory_space<vmem>>, vector<8x8xf32>
      tpu.vector_store %arg9[%c0_24, %c0_25], %38 {strides = array<i32>} : memref<8x8xf32, #tpu.memory_space<vmem>>, vector<8x8xf32>,
      %c0_26 = arith.constant 0 : index
      %c0_27 = arith.constant 0 : index
      %40 = vector.load %arg7[%c0_26, %c0_27] : memref<8x1xf32, #tpu.memory_space<vmem>>, vector<8x1xf32>
      tpu.vector_store %arg7[%c0_26, %c0_27], %22 {strides = array<i32>} : memref<8x1xf32, #tpu.memory_space<vmem>>, vector<8x1xf32>,
    } else {
    }
    %6 = arith.cmpi eq, %arg2, %arg1 : i32
    %7 = arith.extui %6 : i1 to i32
    %c0_i32_2 = arith.constant 0 : i32
    %8 = arith.cmpi ne, %7, %c0_i32_2 : i32
    scf.if %8 {
      %c0 = arith.constant 0 : index
      %c0_5 = arith.constant 0 : index
      %c0_6 = arith.constant 0 : index
      %12 = vector.load %arg3[%c0, %c0_5, %c0_6] : memref<1x8x8xf32, #tpu.memory_space<vmem>>, vector<1x8x8xf32>
      %13 = vector.shape_cast %12 : vector<1x8x8xf32> to vector<8x8xf32>
      %c0_7 = arith.constant 0 : index
      %c0_8 = arith.constant 0 : index
      %c0_9 = arith.constant 0 : index
      %14 = vector.load %arg4[%c0_7, %c0_8, %c0_9] : memref<1x8x8xf32, #tpu.memory_space<vmem>>, vector<1x8x8xf32>
      %15 = vector.shape_cast %14 : vector<1x8x8xf32> to vector<8x8xf32>
      %cst = arith.constant dense<0.000000e+00> : vector<8x8xf32>
      %16 = tpu.matmul %13, %15, %cst {dimension_numbers = #tpu.dot_dimension_numbers<[1], [1], [0], [0], [0, 0, 1, 0], [], []>} : vector<8x8xf32>, vector<8x8xf32>, vector<8x8xf32> -> vector<8x8xf32>
      %17 = tpu.iota {dimensions = array<i32: 0>} : vector<8x8xi32>
      %18 = tpu.iota {dimensions = array<i32: 1>} : vector<8x8xi32>
      %19 = arith.cmpi sle, %18, %17 : vector<8x8xi32>
      %cst_10 = arith.constant -1.000000e+04 : f32
      %20 = vector.broadcast %cst_10 : f32 to vector<8x8xf32>
      %21 = arith.select %19, %16, %20 : vector<8x8xi1>, vector<8x8xf32>
      %c0_11 = arith.constant 0 : index
      %c0_12 = arith.constant 0 : index
      %c0_13 = arith.constant 0 : index
      %22 = vector.load %arg5[%c0_11, %c0_12, %c0_13] : memref<1x8x8xf32, #tpu.memory_space<vmem>>, vector<1x8x8xf32>
      %23 = vector.shape_cast %22 : vector<1x8x8xf32> to vector<8x8xf32>
      %c0_14 = arith.constant 0 : index
      %c0_15 = arith.constant 0 : index
      %24 = vector.load %arg7[%c0_14, %c0_15] : memref<8x1xf32, #tpu.memory_space<vmem>>, vector<8x1xf32>
      %cst_16 = arith.constant dense<0xFF800000> : vector<8xf32>
      %25 = vector.multi_reduction <maximumf>, %21, %cst_16 [1] : vector<8x8xf32> to vector<8xf32>
      %26 = vector.shape_cast %25 : vector<8xf32> to vector<8x1xf32>
      %27 = arith.maximumf %24, %26 : vector<8x1xf32>
      %28 = arith.subf %24, %27 : vector<8x1xf32>
      %29 = math.exp %28 : vector<8x1xf32>
      %30 = vector.broadcast %27 : vector<8x1xf32> to vector<8x8xf32>
      %31 = arith.subf %21, %30 : vector<8x8xf32>
      %32 = math.exp %31 : vector<8x8xf32>
      %c0_17 = arith.constant 0 : index
      %c0_18 = arith.constant 0 : index
      %33 = vector.load %arg8[%c0_17, %c0_18] : memref<8x1xf32, #tpu.memory_space<vmem>>, vector<8x1xf32>
      %34 = arith.mulf %29, %33 : vector<8x1xf32>
      %cst_19 = arith.constant dense<0.000000e+00> : vector<8xf32>
      %35 = vector.multi_reduction <add>, %32, %cst_19 [1] : vector<8x8xf32> to vector<8xf32>
      %36 = vector.shape_cast %35 : vector<8xf32> to vector<8x1xf32>
      %37 = arith.addf %34, %36 : vector<8x1xf32>
      %c0_20 = arith.constant 0 : index
      %c0_21 = arith.constant 0 : index
      %38 = vector.load %arg8[%c0_20, %c0_21] : memref<8x1xf32, #tpu.memory_space<vmem>>, vector<8x1xf32>
      tpu.vector_store %arg8[%c0_20, %c0_21], %37 {strides = array<i32>} : memref<8x1xf32, #tpu.memory_space<vmem>>, vector<8x1xf32>,
      %c0_22 = arith.constant 0 : index
      %c0_23 = arith.constant 0 : index
      %39 = vector.load %arg9[%c0_22, %c0_23] : memref<8x8xf32, #tpu.memory_space<vmem>>, vector<8x8xf32>
      %40 = vector.broadcast %29 : vector<8x1xf32> to vector<8x8xf32>
      %41 = arith.mulf %40, %39 : vector<8x8xf32>
      %cst_24 = arith.constant dense<0.000000e+00> : vector<8x8xf32>
      %42 = tpu.matmul %32, %23, %cst_24 {dimension_numbers = #tpu.dot_dimension_numbers<[1], [0], [0], [1], [0, 0, 1, 1], [], []>} : vector<8x8xf32>, vector<8x8xf32>, vector<8x8xf32> -> vector<8x8xf32>
      %43 = arith.addf %41, %42 : vector<8x8xf32>
      %c0_25 = arith.constant 0 : index
      %c0_26 = arith.constant 0 : index
      %44 = vector.load %arg9[%c0_25, %c0_26] : memref<8x8xf32, #tpu.memory_space<vmem>>, vector<8x8xf32>
      tpu.vector_store %arg9[%c0_25, %c0_26], %43 {strides = array<i32>} : memref<8x8xf32, #tpu.memory_space<vmem>>, vector<8x8xf32>,
      %c0_27 = arith.constant 0 : index
      %c0_28 = arith.constant 0 : index
      %45 = vector.load %arg7[%c0_27, %c0_28] : memref<8x1xf32, #tpu.memory_space<vmem>>, vector<8x1xf32>
      tpu.vector_store %arg7[%c0_27, %c0_28], %27 {strides = array<i32>} : memref<8x1xf32, #tpu.memory_space<vmem>>, vector<8x1xf32>,
    } else {
    }
    %c0_i32_3 = arith.constant 0 : i32
    %9 = arith.cmpi eq, %arg2, %c0_i32_3 : i32
    %10 = arith.extui %9 : i1 to i32
    %c0_i32_4 = arith.constant 0 : i32
    %11 = arith.cmpi ne, %10, %c0_i32_4 : i32
    scf.if %11 {
      %c0 = arith.constant 0 : index
      %c0_5 = arith.constant 0 : index
      %12 = vector.load %arg8[%c0, %c0_5] : memref<8x1xf32, #tpu.memory_space<vmem>>, vector<8x1xf32>
      %13 = tpu.reciprocal %12 {approx = true} : vector<8x1xf32> -> vector<8x1xf32>
      %c0_6 = arith.constant 0 : index
      %c0_7 = arith.constant 0 : index
      %14 = vector.load %arg9[%c0_6, %c0_7] : memref<8x8xf32, #tpu.memory_space<vmem>>, vector<8x8xf32>
      %15 = vector.broadcast %13 : vector<8x1xf32> to vector<8x8xf32>
      %16 = arith.mulf %14, %15 : vector<8x8xf32>
      %c0_8 = arith.constant 0 : index
      %c0_9 = arith.constant 0 : index
      %c0_10 = arith.constant 0 : index
      %17 = vector.load %arg6[%c0_8, %c0_9, %c0_10] : memref<1x8x8xf32, #tpu.memory_space<vmem>>, vector<1x8x8xf32>
      %18 = vector.shape_cast %17 : vector<1x8x8xf32> to vector<8x8xf32>
      %19 = vector.shape_cast %16 : vector<8x8xf32> to vector<1x8x8xf32>
      tpu.vector_store %arg6[%c0_8, %c0_9, %c0_10], %19 {strides = array<i32>} : memref<1x8x8xf32, #tpu.memory_space<vmem>>, vector<1x8x8xf32>,
    } else {
    }
    return
  }
  func.func @transform_0(%arg0: i32, %arg1: i32, %arg2: i32) -> (i32, i32, i32) {
    %c0_i32 = arith.constant 0 : i32
    %c0_i32_0 = arith.constant 0 : i32
    return %arg0, %arg1, %c0_i32 : i32, i32, i32
  }
  func.func @transform_1(%arg0: i32, %arg1: i32, %arg2: i32) -> (i32, i32, i32) {
    %c0_i32 = arith.constant 0 : i32
    %c0_i32_0 = arith.constant 0 : i32
    return %arg0, %arg2, %c0_i32 : i32, i32, i32
  }
  func.func @transform_2(%arg0: i32, %arg1: i32, %arg2: i32) -> (i32, i32, i32) {
    %c0_i32 = arith.constant 0 : i32
    %c0_i32_0 = arith.constant 0 : i32
    return %arg0, %arg2, %c0_i32 : i32, i32, i32
  }
  func.func @transform_3(%arg0: i32, %arg1: i32, %arg2: i32) -> (i32, i32, i32) {
    %c0_i32 = arith.constant 0 : i32
    %c0_i32_0 = arith.constant 0 : i32
    return %arg0, %arg1, %c0_i32 : i32, i32, i32
  }
}

module attributes {stable_mosaic.version = 11 : i64} {
  func.func @_conv1d_kernel(%arg0: i32, %arg1: i32, %arg2: i32, %arg3: memref<16x32xf32, #tpu.memory_space<vmem>>, %arg4: memref<32x32xf32, #tpu.memory_space<vmem>>, %arg5: memref<1x32xf32, #tpu.memory_space<vmem>>, %arg6: memref<16x32xf32, #tpu.memory_space<vmem>>, %arg7: memref<16x32xf32, #tpu.memory_space<vmem>>) attributes {dimension_semantics = [#tpu.dimension_semantics<parallel>, #tpu.dimension_semantics<parallel>, #tpu.dimension_semantics<arbitrary>], iteration_bounds = array<i64: 1, 1, 1>, scalar_prefetch = 0 : i64, scratch_operands = 1 : i64, tpu.core_type = #tpu.core_type<tc>, window_params = [{transform_indices = @transform_0, window_bounds = array<i64: 16, 32>}, {transform_indices = @transform_1, window_bounds = array<i64: 32, 32>}, {transform_indices = @transform_2, window_bounds = array<i64: 1, 32>}, {transform_indices = @transform_3, window_bounds = array<i64: 16, 32>}]} {
    %c0_i32 = arith.constant 0 : i32
    %0 = arith.cmpi eq, %arg2, %c0_i32 : i32
    %1 = arith.extui %0 : i1 to i32
    %c0_i32_0 = arith.constant 0 : i32
    %2 = arith.cmpi ne, %1, %c0_i32_0 : i32
    scf.if %2 {
      %cst_10 = arith.constant 0.000000e+00 : f32
      %12 = vector.broadcast %cst_10 : f32 to vector<16x32xf32>
      %c0_11 = arith.constant 0 : index
      %c0_12 = arith.constant 0 : index
      %13 = vector.load %arg7[%c0_11, %c0_12] : memref<16x32xf32, #tpu.memory_space<vmem>>, vector<16x32xf32>
      tpu.vector_store %arg7[%c0_11, %c0_12], %12 {strides = array<i32>} : memref<16x32xf32, #tpu.memory_space<vmem>>, vector<16x32xf32>,
    } else {
    }
    %c0 = arith.constant 0 : index
    %c0_1 = arith.constant 0 : index
    %3 = vector.load %arg7[%c0, %c0_1] : memref<16x32xf32, #tpu.memory_space<vmem>>, vector<16x32xf32>
    %c0_2 = arith.constant 0 : index
    %c0_3 = arith.constant 0 : index
    %4 = vector.load %arg3[%c0_2, %c0_3] : memref<16x32xf32, #tpu.memory_space<vmem>>, vector<16x32xf32>
    %c0_4 = arith.constant 0 : index
    %c0_5 = arith.constant 0 : index
    %5 = vector.load %arg4[%c0_4, %c0_5] : memref<32x32xf32, #tpu.memory_space<vmem>>, vector<32x32xf32>
    %cst = arith.constant dense<0.000000e+00> : vector<16x32xf32>
    %6 = tpu.matmul %4, %5, %cst {dimension_numbers = #tpu.dot_dimension_numbers<[1], [0], [0], [1], [0, 0, 1, 1], [], []>} : vector<16x32xf32>, vector<32x32xf32>, vector<16x32xf32> -> vector<16x32xf32>
    %7 = arith.addf %3, %6 : vector<16x32xf32>
    %c0_6 = arith.constant 0 : index
    %c0_7 = arith.constant 0 : index
    %8 = vector.load %arg7[%c0_6, %c0_7] : memref<16x32xf32, #tpu.memory_space<vmem>>, vector<16x32xf32>
    tpu.vector_store %arg7[%c0_6, %c0_7], %7 {strides = array<i32>} : memref<16x32xf32, #tpu.memory_space<vmem>>, vector<16x32xf32>,
    %c0_i32_8 = arith.constant 0 : i32
    %9 = arith.cmpi eq, %arg2, %c0_i32_8 : i32
    %10 = arith.extui %9 : i1 to i32
    %c0_i32_9 = arith.constant 0 : i32
    %11 = arith.cmpi ne, %10, %c0_i32_9 : i32
    scf.if %11 {
      %c0_10 = arith.constant 0 : index
      %c0_11 = arith.constant 0 : index
      %12 = vector.load %arg7[%c0_10, %c0_11] : memref<16x32xf32, #tpu.memory_space<vmem>>, vector<16x32xf32>
      %c0_12 = arith.constant 0 : index
      %c0_13 = arith.constant 0 : index
      %13 = vector.load %arg5[%c0_12, %c0_13] : memref<1x32xf32, #tpu.memory_space<vmem>>, vector<1x32xf32>
      %14 = vector.broadcast %13 : vector<1x32xf32> to vector<16x32xf32>
      %15 = arith.addf %12, %14 : vector<16x32xf32>
      %c0_14 = arith.constant 0 : index
      %c0_15 = arith.constant 0 : index
      %16 = vector.load %arg6[%c0_14, %c0_15] : memref<16x32xf32, #tpu.memory_space<vmem>>, vector<16x32xf32>
      tpu.vector_store %arg6[%c0_14, %c0_15], %15 {strides = array<i32>} : memref<16x32xf32, #tpu.memory_space<vmem>>, vector<16x32xf32>,
    } else {
    }
    return
  }
  func.func @transform_0(%arg0: i32, %arg1: i32, %arg2: i32) -> (i32, i32) {
    %c0_i32 = arith.constant 0 : i32
    return %arg0, %arg2 : i32, i32
  }
  func.func @transform_1(%arg0: i32, %arg1: i32, %arg2: i32) -> (i32, i32) {
    %c0_i32 = arith.constant 0 : i32
    return %arg2, %arg1 : i32, i32
  }
  func.func @transform_2(%arg0: i32, %arg1: i32, %arg2: i32) -> (i32, i32) {
    %c0_i32 = arith.constant 0 : i32
    %c0_i32_0 = arith.constant 0 : i32
    return %c0_i32, %arg1 : i32, i32
  }
  func.func @transform_3(%arg0: i32, %arg1: i32, %arg2: i32) -> (i32, i32) {
    %c0_i32 = arith.constant 0 : i32
    return %arg0, %arg1 : i32, i32
  }
}

</mosaic_0001>

<bundles_post_ra>
// kernel: attention_forward.3
= control target key start
LH: loop header
LB: loop body
LE: loop exit
PB: predicated region body
PF: predicated region fallthrough
CT: control target
= control target key end

     0   :  { %8 = vsyncpa [#allocation4], 0  ;;  %s207_s12 = smov [#allocation3]   ;;  %s264_s0 = inlined_call_operand.vmem [shape: f32[16,32], index: 0, kind: input, shape index: {}]   ;;  %s265_s1 = inlined_call_operand.hbm [shape: f32[32,96], index: 1, kind: input, shape index: {}]   ;;  %s266_s2 = inlined_call_operand.vmem [shape: f32[1,96], index: 2, kind: input, shape index: {}]   ;;  %s267_s3 = inlined_call_operand.vmem [shape: f32[16,96], index: 3, kind: output, shape index: {}]  }
   0x1   :  { %s16_s13 = sshll.u32 %s207_s12, 4  ;;  %s183_s16 = scalar_lea.hbm %s265_s1, 512  ;;  %s17_s13 = int_to_ptr.vmem [resolvable:$true] %s16_s13 }
   0x2   :  { %p184_p0 = scmp.ne.s32.totalorder %s265_s1, %s183_s16  ;;  %p187_p1 = scmp.lt.u32.totalorder %s183_s16, %s265_s1 }
   0x4   :  { %p189_p2 = pnand %p187_p1, %p184_p0 }
   0x6   :  { %192 = shalt.err (!%p189_p2)
}
   0x7   :  { %s193_s21 = scalar_lea.vmem %s17_s13, 512  ;;  %p198_p4 = scmp.lt.s32.totalorder %s17_s13, %s17_s13 }
   0x8   :  { %p194_p3 = scmp.ne.s32.totalorder %s17_s13, %s193_s21  ;;  %p199_p5 = scmp.lt.s32.totalorder %s193_s21, %s193_s21 }
   0xa   :  { %p200_p6 = por %p199_p5, %p198_p4 }
   0xc   :  { %p201_p7 = pnand %p200_p6, %p194_p3 }
   0xe   :  { %204 = shalt.err (!%p201_p7)
}
   0xf   :  { %s208_s22 = smov 128   ;;  %s209_s23 = smov 8  }
  0x10   :  { %22 = dma.hbm_to_vmem [thread:$0]  %s265_s1, 512, %s17_s13, [#allocation4], %s208_s22, %s208_s22, %s209_s23  }
  0x11   :  { %205 = dma.done.wait [#allocation4], 512  }
  0x12   :  { %206 = vsyncadd [#allocation4], 4294966784  ;;  %vm32_vm0 = vcmask 785408   ;;  %v210_v0 = vmov 0.0   ;;  %vm43_vm1 = vcmask 261120   ;;  %v39_v1 = vld [vmem:[#allocation3] sm:$0xff] }
  0x13   :  { %34 = vst.msk [vmem:[#allocation2 + $0x8] sm:$0xff] %vm32_vm0, %v210_v0  ;;  %33 = vst.msk [vmem:[#allocation2] sm:$0xff] %vm32_vm0, %v210_v0  ;;  %v40_v2 = vld [vmem:[#allocation3 + $0x8] sm:$0xff]  ;;  %v41_v3 = vld [vmem:[#allocation3 + $0x10] sm:$0xff] }
  0x14   :  { %v171_v4 = vpack.c.bf16 %v40_v2, %v39_v1  ;;  %v42_v5 = vld [vmem:[#allocation3 + $0x18] sm:$0xff]  ;;  %v37_v6 = vld [vmem:[%s264_s0] sm:$0xff] }
  0x15   :  { %v175_v7 = vpack.c.bf16 %v42_v5, %v41_v3  ;;  %168 = vmatprep.mubr.msk.f32.mxu0 %vm43_vm1, %v37_v6  ;;  %v38_v8 = vld [vmem:[%s264_s0 + $0x8] sm:$0xff]  ;;  %v153_v15 = vld [vmem:[%s266_s2] ss:$0 sm:$0xff] }
  0x16   :  { %172 = vmatprep.subr.bf16.mxu0 %v171_v4 }
  0x17   :  { %174 = vmatpush3.bf16.msra.mxu0 %v171_v4 }
  0x18   :  { %176 = vmatprep.subr.bf16.mxu0 %v175_v7 }
  0x1a   :  { %v36_v9 = vld [vmem:[#allocation2 + $0x8] sm:$0xff]  ;;  %v35_v10 = vld [vmem:[#allocation2] sm:$0xff] }
  0x1b   :  { %178 = vmatpush3.bf16.msra.mxu0 %v175_v7 }
  0x1e   :  { %169 = vmatmul.mubr.msk.f32.vlgmr.msra.gmra.mrb[0].mxu0 %vm43_vm1, %v38_v8 }
  0xf1   :  { %v170_v11 = vpop.f32.mrb[0].mxu0 }
  0xf2   :  { %v126_v12 = vadd.f32 %v170_v11, %v36_v9  ;;  %v116_v13 = vpop.f32.mrb[1].mxu0 }
  0xf3   :  { %v125_v14 = vadd.f32 %v116_v13, %v35_v10 }
  0xf4   :  { %129 = vst.msk [vmem:[#allocation2 + $0x8] sm:$0xff] %vm32_vm0, %v126_v12 }
  0xf5   :  { %128 = vst.msk [vmem:[#allocation2] sm:$0xff] %vm32_vm0, %v125_v14 }
  0xfb   :  { %v134_v16 = vld [vmem:[#allocation2 + $0x8] sm:$0xff] }
  0xfc   :  { %v143_v17 = vadd.f32 %v153_v15, %v134_v16  ;;  %v133_v18 = vld [vmem:[#allocation2] sm:$0xff] }
  0xfd   :  { %v142_v19 = vadd.f32 %v153_v15, %v133_v18 }
  0xfe   :  { %145 = vst.msk [vmem:[%s267_s3 + $0x8] sm:$0xff] %vm32_vm0, %v143_v17 }
  0xff   :  { %144 = vst.msk [vmem:[%s267_s3] sm:$0xff] %vm32_vm0, %v142_v19 }
 0x100   :  { %150 = vsyncpa [#allocation4], 1 }

// kernel: attention_forward.5
= control target key start
LH: loop header
LB: loop body
LE: loop exit
PB: predicated region body
PF: predicated region fallthrough
CT: control target
= control target key end

     0   :  { %vm19_vm0 = vcmask 261120   ;;  %v204_v6 = vmov 0.0   ;;  %s269_s0 = inlined_call_operand.vmem [shape: f32[16,32], index: 0, kind: input, shape index: {}]   ;;  %s270_s1 = inlined_call_operand.vmem [shape: f32[32,32], index: 1, kind: input, shape index: {}]   ;;  %s271_s2 = inlined_call_operand.vmem [shape: f32[1,32], index: 2, kind: input, shape index: {}]   ;;  %s272_s3 = inlined_call_operand.hbm [shape: f32[16,32], index: 3, kind: output, shape index: {}]  }
   0x1   :  { %v26_v0 = vld [vmem:[%s270_s1] sm:$0xff]  ;;  %v27_v1 = vld [vmem:[%s270_s1 + $0x8] sm:$0xff]  ;;  %v28_v2 = vld [vmem:[%s270_s1 + $0x10] sm:$0xff]  ;;  %21 = vst.msk [vmem:[#allocation2 + $0x8] sm:$0xff] %vm19_vm0, %v204_v6 }
   0x2   :  { %v168_v3 = vpack.c.bf16 %v27_v1, %v26_v0  ;;  %v29_v4 = vld [vmem:[%s270_s1 + $0x18] sm:$0xff]  ;;  %v24_v5 = vld [vmem:[%s269_s0] sm:$0xff]  ;;  %20 = vst.msk [vmem:[#allocation2] sm:$0xff] %vm19_vm0, %v204_v6 }
   0x3   :  { %v172_v7 = vpack.c.bf16 %v29_v4, %v28_v2  ;;  %165 = vmatprep.mubr.msk.f32.mxu0 %vm19_vm0, %v24_v5 }
   0x4   :  { %8 = vsyncpa [#allocation4], 0  ;;  %169 = vmatprep.subr.bf16.mxu0 %v168_v3  ;;  %v25_v8 = vld [vmem:[%s269_s0 + $0x8] sm:$0xff]  ;;  %v150_v15 = vld [vmem:[%s271_s2] ss:$0 sm:$0xff]  ;;  %s205_s25 = smov [#allocation3]  }
   0x5   :  { %171 = vmatpush3.bf16.msra.mxu0 %v168_v3  ;;  %s137_s26 = sshll.u32 %s205_s25, 4  ;;  %s138_s26 = int_to_ptr.vmem [resolvable:$true] %s137_s26 }
   0x6   :  { %173 = vmatprep.subr.bf16.mxu0 %v172_v7  ;;  %s180_s0 = scalar_lea.vmem %s138_s26, 256  ;;  %p185_p1 = scmp.lt.s32.totalorder %s138_s26, %s138_s26 }
   0x7   :  { %p181_p0 = scmp.ne.s32.totalorder %s138_s26, %s180_s0  ;;  %p186_p2 = scmp.lt.s32.totalorder %s180_s0, %s180_s0 }
   0x8   :  { %v23_v9 = vld [vmem:[#allocation2 + $0x8] sm:$0xff] }
   0x9   :  { %175 = vmatpush3.bf16.msra.mxu0 %v172_v7  ;;  %v22_v10 = vld [vmem:[#allocation2] sm:$0xff]  ;;  %p187_p3 = por %p186_p2, %p185_p1 }
   0xb   :  { %p188_p4 = pnand %p187_p3, %p181_p0 }
   0xc   :  { %166 = vmatmul.mubr.msk.f32.vlgmr.msra.gmra.mrb[0].mxu0 %vm19_vm0, %v25_v8 }
  0xdf   :  { %v167_v11 = vpop.f32.mrb[0].mxu0 }
  0xe0   :  { %v113_v12 = vadd.f32 %v167_v11, %v23_v9  ;;  %v103_v13 = vpop.f32.mrb[1].mxu0 }
  0xe1   :  { %v112_v14 = vadd.f32 %v103_v13, %v22_v10 }
  0xe2   :  { %115 = vst.msk [vmem:[#allocation2 + $0x8] sm:$0xff] %vm19_vm0, %v113_v12 }
  0xe3   :  { %114 = vst.msk [vmem:[#allocation2] sm:$0xff] %vm19_vm0, %v112_v14 }
  0xe9   :  { %v120_v16 = vld [vmem:[#allocation2 + $0x8] sm:$0xff] }
  0xea   :  { %v119_v17 = vld [vmem:[#allocation2] sm:$0xff]  ;;  %v129_v18 = vadd.f32 %v150_v15, %v120_v16 }
  0xeb   :  { %v128_v19 = vadd.f32 %v150_v15, %v119_v17 }
  0xec   :  { %131 = vst.msk [vmem:[#allocation3 + $0x8] sm:$0xff] %vm19_vm0, %v129_v18 }
  0xed   :  { %130 = vst.msk [vmem:[#allocation3] sm:$0xff] %vm19_vm0, %v128_v19 }
  0xee   :  { %191 = shalt.err (!%p188_p4)
}
  0xef   :  { %s192_s28 = scalar_lea.hbm %s272_s3, 256 }
  0xf0   :  { %p193_p5 = scmp.ne.s32.totalorder %s272_s3, %s192_s28  ;;  %p196_p6 = scmp.lt.u32.totalorder %s192_s28, %s272_s3 }
  0xf2   :  { %p198_p7 = pnand %p196_p6, %p193_p5 }
  0xf4   :  { %201 = shalt.err (!%p198_p7)
}
  0xf5   :  { %s206_s6 = smov 128   ;;  %s207_s7 = smov 8  }
  0xf6   :  { %143 = dma.vmem_to_hbm [thread:$0]  %s138_s26, 256, %s272_s3, [#allocation4], %s206_s6, %s206_s6, %s207_s7  }
  0xf7   :  { %202 = dma.done.wait [#allocation4], 256  }
  0xf8   :  { %203 = vsyncadd [#allocation4], 4294967040 }
  0xf9   :  { %147 = vsyncpa [#allocation4], 1 }

// kernel: attention_forward.4
= control target key start
LH: loop header
LB: loop body
LE: loop exit
PB: predicated region body
PF: predicated region fallthrough
CT: control target
= control target key end

     0   :  { %s893_s12 = smov 0   ;;  %s895_s13 = smov 0   ;;  %s950_s0 = inlined_call_operand.vmem [shape: f32[8,8,8], index: 0, kind: input, shape index: {}]   ;;  %s951_s1 = inlined_call_operand.vmem [shape: f32[8,8,8], index: 1, kind: input, shape index: {}]   ;;  %s952_s2 = inlined_call_operand.vmem [shape: f32[8,8,8], index: 2, kind: input, shape index: {}]   ;;  %s953_s3 = inlined_call_operand.vmem [shape: f32[8,8,8], index: 3, kind: output, shape index: {}]  }
   0x1   :  { %s897_s14 = smov 0  }
   0x2 LB: > { %s32_s15 = sadd.s32 1, %s863_s13  ;;  %p782_p0 = scmp.ge.s32.totalorder %s867_s14, 1  ;;  %s867_s14 = sphi %s897_s14, %s13_s14   ;;  %s863_s13 = sphi %s895_s13, %s955_s13   ;;  %s859_s12 = sphi %s893_s12, %s954_s12  }
   0x3   : > { %p34_p1 = scmp.ge.s32.totalorder %s32_s15, 8  ;;  %p190_p2 = scmp.lt.s32.totalorder %s867_s14, 9 }
   0x5   : > { %s957_s15 = smov (%p34_p1, %s32_s15), 0  ;;  %p191_p3 = pnand %p782_p0, %p190_p2 }
   0x6   : > { %p232_p4 = scmp.lt.s32.totalorder (!%p191_p3), %s859_s12, 7  ;;  %vm267_vm0 = vcmask (!%p191_p3), 64512   ;;  %v869_v0 = vmov (!%p191_p3), 0.0   ;;  %vm870_vm1 = vmmov (!%p191_p3), 0   ;;  %vm264_vm2 = vcmask (!%p191_p3), 7168  }
   0x7   : > { %194 = sbr.rel (%p191_p3) target bundleno = 817 (0x331), region = 32  ;;  %799 = vmatprep.subr.mxu0 (!%p191_p3), %v869_v0  ;;  %268 = vst.msk [vmem:[#allocation4] sm:$0xff] (!%p191_p3), %vm267_vm0, %v869_v0  ;;  %801 = vmatprep.mubr.msk.f32.mxu0 (!%p191_p3), %vm870_vm1, %v869_v0  ;;  %v871_v3 = vmov (!%p191_p3), -inf   ;;  %v543_v4 = vlaneseq (!%p191_p3)  ;;  %v872_v11 = vmov (!%p191_p3), 0  }
   0x8   : > { %804 = vmatprep.subr.mxu1 (!%p191_p3), %v869_v0  ;;  %806 = vmatprep.mubr.msk.f32.mxu1 (!%p191_p3), %vm870_vm1, %v869_v0  ;;  %265 = vst.msk [vmem:[#allocation2] sm:$0xff] (!%p191_p3), %vm264_vm2, %v871_v3  ;;  %266 = vst.msk [vmem:[#allocation3] sm:$0xff] (!%p191_p3), %vm264_vm2, %v869_v0 }
   0x9   : > { %v544_v5 = vshrl.u32 (!%p191_p3), %v543_v4, 7  ;;  %v546_v6 = vand.u32 (!%p191_p3), 127, %v543_v4  ;;  %837 = vset.pattern.permute.xlu0 (!%p191_p3), %v872_v11  ;;  %838 = vset.pattern.permute.xlu1 (!%p191_p3), %v872_v11 }
   0xb   : > { %vm547_vm3 = vcmp.le.s32.totalorder (!%p191_p3), %v546_v6, %v544_v5 }
   0xe   : > { %s959_s12 = smov (!%p232_p4, %s859_s12), 7  ;;  %v574_v30 = vld [vmem:[#allocation4] sm:$0xff] }
   0xf   : > { %s912_s16 = sshll.u32 %s959_s12, 3  ;;  %v550_v12 = vld [vmem:[#allocation2] sm:$0xff]  ;;  %v566_v24 = vld [vmem:[#allocation3] sm:$0xff] }
  0x10   : > { %s245_s19 = scalar_lea.vmem %s951_s1, %s912_s16  ;;  %s238_s22 = scalar_lea.vmem %s950_s0, %s912_s16 }
  0x11   : > { %v465_v1 = vld [vmem:[%s245_s19] sm:$0xff]  ;;  %s252_s25 = scalar_lea.vmem %s952_s2, %s912_s16  ;;  %s259_s28 = scalar_lea.vmem %s953_s3, %s912_s16 }
  0x12   : > { %800 = vmatpush3.xpose.msk.msra.mxu0 %vm267_vm0, %v465_v1  ;;  %v464_v2 = vld [vmem:[%s238_s22] sm:$0xff] }
  0x13   : > { %v549_v16 = vld [vmem:[%s252_s25] sm:$0xff] }
  0x14   : > { %805 = vmatpush3.msra.mxu1 %v549_v16 }
  0x15   : > { %802 = vmatmul.mubr.msk.f32.vlgmr.msra.gmra.mrb[0].mxu0 %vm267_vm0, %v464_v2 }
  0xe8   : > { %v539_v7 = vpop.f32.mrb[0].mxu0 }
  0xe9   : > { %v548_v8 = vsel %vm547_vm3, %v539_v7, -10000.0  ;;  %v803_v9 = vpop.f32.mrb[1].mxu0 }
  0xea   : > { %v551_v10 = vsel %vm267_vm0, %v548_v8, -inf }
  0xeb   : > { %552 = vmax.xlane.f32.xlu0 %v551_v10 }
 0x178   : > { %v553_v13 = vpop.xlane.xlu0 %552 }
 0x179   : > { %v554_v14 = vmax.f32 %v550_v12, %v553_v13 }
 0x17b   : > { %v555_v15 = vsub.f32 %v550_v12, %v554_v14  ;;  %656 = vst.msk [vmem:[#allocation2] sm:$0xff] %vm264_vm2, %v554_v14  ;;  %560 = vperm.xlu0 %837, %v554_v14  }
 0x17d   : > { %v556_v22 = vmul.f32 1.442695, %v555_v15 }
 0x1fa   : > { %v561_v17 = vpop.permute.xlu0 %560 }
 0x1fb   : > { %v563_v18 = vsub.f32 %v548_v8, %v561_v17 }
 0x1fd   : > { %v564_v19 = vmul.f32 1.442695, %v563_v18 }
 0x1ff   : > { %839 = vpow2.f32 %v564_v19 }
 0x200   : > { %841 = vpow2.f32 %v556_v22 }
 0x209   : > { %v840_v20 = vpop.eup %839 }
 0x20a   : > { %807 = vmatmul.mubr.msk.f32.vlgmr.msra.gmra.mrb[0].mxu1 %vm267_vm0, %v840_v20  ;;  %v568_v21 = vsel %vm267_vm0, %v840_v20, 0.0  ;;  %v842_v23 = vpop.eup %841 }
 0x20b   : > { %569 = vadd.xlane.f32.xlu1 %v568_v21  ;;  %v567_v25 = vmul.f32 %v842_v23, %v566_v24 }
 0x21c   : > { %577 = vperm.xlu1 %838, %v842_v23  }
 0x298   : > { %v570_v26 = vpop.xlane.xlu1 %569 }
 0x299   : > { %v571_v27 = vadd.f32 %v570_v26, %v567_v25 }
 0x29b   : > { %573 = vst.msk [vmem:[#allocation3] sm:$0xff] %vm264_vm2, %v571_v27 }
 0x29c   : > { %v578_v31 = vpop.permute.xlu1 %577 }
 0x29d   : > { %v580_v32 = vmul.f32 %v578_v31, %v574_v30 }
 0x2a2   : > { %v660_v28 = vld [vmem:[#allocation3] sm:$0xff] }
 0x2a3   : > { %843 = vrcp.f32 %v660_v28 }
 0x2ad   : > { %v844_v29 = vpop.eup %843 }
 0x2ae   : > { %665 = vperm.xlu1 %838, %v844_v29  }
 0x2dd   : > { %v650_v33 = vpop.f32.mrb[0].mxu1 }
 0x2de   : > { %v654_v34 = vadd.f32 %v650_v33, %v580_v32  ;;  %v808_v35 = vpop.f32.mrb[1].mxu1 }
 0x2e0   : > { %655 = vst.msk [vmem:[#allocation4] sm:$0xff] %vm267_vm0, %v654_v34 }
 0x2e7   : > { %v662_v36 = vld [vmem:[#allocation4] sm:$0xff] }
 0x32d   : > { %v666_v37 = vpop.permute.xlu1 %665 }
 0x32e   : > { %v668_v38 = vmul.f32 %v666_v37, %v662_v36 }
 0x330   : > { %670 = vst.msk [vmem:[%s259_s28] sm:$0xff] %vm267_vm0, %v668_v38 }
 0x331 PF: > { %s13_s14 = sadd.s32 1, %s867_s14   ;;  %s954_s12 = smov %s863_s13 }
 0x332   : > { %p10_p5 = scmp.ge.s32.totalorder %s13_s14, 10   ;;  %s955_s13 = smov %s957_s15 }
 0x334   :  { %12 = sbr.rel (!%p10_p5) target bundleno = 2 (0x2), region = 84 }

</bundles_post_ra>
